<compile_context>
chip_gen: v7x
topology: tpu7x:2x2x1
jax: 0.10.0
libtpu: 0.0.40
codegen_flags: <defaults>
</compile_context>

<pallas_src>
import jax
import jax.numpy as jnp
from jax.experimental import pallas as pl
from jax.experimental.pallas import tpu as pltpu


def _round_up(x, m):
    return (x + m - 1) // m * m


# ---------------------------------------------------------------------------
# Kernels
# ---------------------------------------------------------------------------
def _gather_mul_kernel(cur_ref, last_ref, table_ref, o_ref):
    """One-hot MXU gather of current & last rows, then elementwise multiply."""
    tb = o_ref.shape[0]
    tbl = table_ref[...]                                     # (V, D), resident
    v = tbl.shape[0]
    col = jax.lax.broadcasted_iota(jnp.int32, (tb, v), 1)    # (TB, V)
    onehot_cur = (col == cur_ref[...]).astype(tbl.dtype)     # (TB, V)
    onehot_last = (col == last_ref[...]).astype(tbl.dtype)   # (TB, V)
    cur_emb = jnp.dot(onehot_cur, tbl, preferred_element_type=jnp.float32)
    last_emb = jnp.dot(onehot_last, tbl, preferred_element_type=jnp.float32)
    o_ref[...] = (cur_emb * last_emb).astype(o_ref.dtype)


def _gather_kernel(cur_ref, table_ref, o_ref):
    """One-hot MXU gather of current rows only (path length == 1 branch)."""
    tb = o_ref.shape[0]
    tbl = table_ref[...]
    v = tbl.shape[0]
    col = jax.lax.broadcasted_iota(jnp.int32, (tb, v), 1)
    onehot_cur = (col == cur_ref[...]).astype(tbl.dtype)
    o_ref[...] = jnp.dot(
        onehot_cur, tbl, preferred_element_type=jnp.float32
    ).astype(o_ref.dtype)


# ---------------------------------------------------------------------------
# Wrapper
# ---------------------------------------------------------------------------
def path_encoder_forward(emb_table, current_ids, last_ids=None):
    """Pallas implementation of PathEncoder.forward.

    emb_table:   (V, D) float embedding weights (post-GCN in the reference).
    current_ids: (B,)   integer node ids (sample[-1]).
    last_ids:    (B,)   integer node ids (sample[-2]) or None if path len == 1.
    Returns:     (B, D) embeddings.
    """
    V, D = emb_table.shape
    B = current_ids.shape[0]

    # Tile sizing: pad the batch to 8-aligned tiles; grow TB (up to 256 rows)
    # to amortize per-step overhead while keeping >= 2 grid steps once B >= 16
    # so the "parallel" axis can use both v7x TensorCores.
    B_pad = _round_up(max(B, 1), 8)
    if B_pad >= 16:
        TB = min(256, _round_up(B_pad // 2, 8))
    else:
        TB = B_pad
    B_pad = _round_up(B_pad, TB)
    grid = (B_pad // TB,)

    def prep_ids(ids):
        # int32 for TPU, clamp OOB ids (PyTorch would raise; we never read OOB),
        # pad to B_pad with a valid id, shape (B_pad, 1) for sublane layout.
        ids = jnp.clip(ids.astype(jnp.int32), 0, V - 1)
        ids = jnp.pad(ids, (0, B_pad - B))
        return ids.reshape(B_pad, 1)

    ids_spec = pl.BlockSpec((TB, 1), lambda i: (i, 0))
    table_spec = pl.BlockSpec((V, D), lambda i: (0, 0))     # resident table
    out_spec = pl.BlockSpec((TB, D), lambda i: (i, 0))      # lane-dense output
    out_shape = jax.ShapeDtypeStruct((B_pad, D), emb_table.dtype)

    n_ids = 1 if last_ids is None else 2
    itemsize = jnp.dtype(emb_table.dtype).itemsize
    cost = pl.CostEstimate(
        flops=2 * n_ids * B_pad * V * D + B_pad * D,
        transcendentals=0,
        bytes_accessed=V * D * itemsize + B_pad * D * itemsize + n_ids * B_pad * 4,
    )
    compiler_params = pltpu.CompilerParams(
        # No-op on v5e/v6e (single TC, grid is a sequential loop); lets v7x
        # shard the batch axis across its two TensorCores when grid >= 2.
        dimension_semantics=("parallel",),
    )

    if last_ids is None:
        out = pl.pallas_call(
            _gather_kernel,
            out_shape=out_shape,
            grid_spec=pltpu.PrefetchScalarGridSpec(
                num_scalar_prefetch=0,
                grid=grid,
                in_specs=[ids_spec, table_spec],
                out_specs=out_spec,
            ),
            compiler_params=compiler_params,
            cost_estimate=cost,
        )(prep_ids(current_ids), emb_table)
    else:
        out = pl.pallas_call(
            _gather_mul_kernel,
            out_shape=out_shape,
            grid_spec=pltpu.PrefetchScalarGridSpec(
                num_scalar_prefetch=0,
                grid=grid,
                in_specs=[ids_spec, ids_spec, table_spec],
                out_specs=out_spec,
            ),
            compiler_params=compiler_params,
            cost_estimate=cost,
        )(prep_ids(current_ids), prep_ids(last_ids), emb_table)

    return out[:B]


# ---------------------------------------------------------------------------
# Main
# ---------------------------------------------------------------------------
if __name__ == "__main__":
    key = jax.random.PRNGKey(0)
    k_emb, k_path, k_big = jax.random.split(key, 3)

    # Small, deterministic problem sizes consistent with the module:
    #   len(args.node2id)          -> V = 64 nodes
    #   args.node_embedding_size   -> D = 128
    #   batch of action paths      -> B = 8, path length = 3
    V, D, B, PATH_LEN = 64, 128, 8, 3

    # Deterministic "post-GCN" embedding table (stand-in for gcn(g, weight)).
    emb_table = jax.random.normal(k_emb, (V, D), dtype=jnp.float32)

    # actionList: B paths of length PATH_LEN with node ids in [0, V).
    action_list = jax.random.randint(k_path, (B, PATH_LEN), 0, V, dtype=jnp.int32)
    current_ids = action_list[:, -1]   # sample[-1]
    last_ids = action_list[:, -2]      # sample[-2] (path length > 1)

    # Path length > 1 branch.
    out = jax.block_until_ready(path_encoder_forward(emb_table, current_ids, last_ids))
    ref = emb_table[current_ids] * emb_table[last_ids]
    assert out.shape == (B, D)
    assert jnp.allclose(out, ref, atol=1e-6), "mismatch vs reference (len>1 branch)"

    # Path length == 1 branch (no multiply).
    out1 = jax.block_until_ready(path_encoder_forward(emb_table, current_ids))
    assert jnp.allclose(out1, emb_table[current_ids], atol=1e-6), "mismatch (len==1)"

    # Non-multiple-of-8 batch exercises the padding path.
    out5 = jax.block_until_ready(
        path_encoder_forward(emb_table, current_ids[:5], last_ids[:5]))
    assert jnp.allclose(out5, ref[:5], atol=1e-6), "mismatch (padded batch)"

    # Larger batch exercises the multi-step grid (>= 2 steps for v7x megacore).
    big_paths = jax.random.randint(k_big, (32, PATH_LEN), 0, V, dtype=jnp.int32)
    out32 = jax.block_until_ready(
        path_encoder_forward(emb_table, big_paths[:, -1], big_paths[:, -2]))
    ref32 = emb_table[big_paths[:, -1]] * emb_table[big_paths[:, -2]]
    assert jnp.allclose(out32, ref32, atol=1e-6), "mismatch (multi-step grid)"

    print("KERNEL_OK")
</pallas_src>

<mosaic_0001>
module attributes {stable_mosaic.version = 11 : i64} {
  func.func @_gather_mul_kernel(%arg0: i32, %arg1: memref<8x1xi32, #tpu.memory_space<vmem>>, %arg2: memref<8x1xi32, #tpu.memory_space<vmem>>, %arg3: memref<64x128xf32, #tpu.memory_space<vmem>>, %arg4: memref<8x128xf32, #tpu.memory_space<vmem>>) attributes {dimension_semantics = [#tpu.dimension_semantics<parallel>], iteration_bounds = array<i64: 1>, scalar_prefetch = 0 : i64, scratch_operands = 0 : i64, tpu.core_type = #tpu.core_type<tc>, window_params = [{transform_indices = @transform_0, window_bounds = array<i64: 8, 1>}, {transform_indices = @transform_1, window_bounds = array<i64: 8, 1>}, {pipeline_mode = #tpu.pipeline_mode<synchronous>, transform_indices = @transform_2, window_bounds = array<i64: 64, 128>}, {transform_indices = @transform_3, window_bounds = array<i64: 8, 128>}]} {
    %c0 = arith.constant 0 : index
    %c0_0 = arith.constant 0 : index
    %0 = vector.load %arg3[%c0, %c0_0] : memref<64x128xf32, #tpu.memory_space<vmem>>, vector<64x128xf32>
    %1 = tpu.iota {dimensions = array<i32: 1>} : vector<8x64xi32>
    %c0_1 = arith.constant 0 : index
    %c0_2 = arith.constant 0 : index
    %2 = vector.load %arg1[%c0_1, %c0_2] : memref<8x1xi32, #tpu.memory_space<vmem>>, vector<8x1xi32>
    %3 = vector.broadcast %2 : vector<8x1xi32> to vector<8x64xi32>
    %4 = arith.cmpi eq, %1, %3 : vector<8x64xi32>
    %5 = arith.extui %4 : vector<8x64xi1> to vector<8x64xi32>
    %6 = arith.sitofp %5 : vector<8x64xi32> to vector<8x64xf32>
    %c0_3 = arith.constant 0 : index
    %c0_4 = arith.constant 0 : index
    %7 = vector.load %arg2[%c0_3, %c0_4] : memref<8x1xi32, #tpu.memory_space<vmem>>, vector<8x1xi32>
    %8 = vector.broadcast %7 : vector<8x1xi32> to vector<8x64xi32>
    %9 = arith.cmpi eq, %1, %8 : vector<8x64xi32>
    %10 = arith.extui %9 : vector<8x64xi1> to vector<8x64xi32>
    %11 = arith.sitofp %10 : vector<8x64xi32> to vector<8x64xf32>
    %cst = arith.constant dense<0.000000e+00> : vector<8x128xf32>
    %12 = tpu.matmul %6, %0, %cst {dimension_numbers = #tpu.dot_dimension_numbers<[1], [0], [0], [1], [0, 0, 1, 1], [], []>} : vector<8x64xf32>, vector<64x128xf32>, vector<8x128xf32> -> vector<8x128xf32>
    %cst_5 = arith.constant dense<0.000000e+00> : vector<8x128xf32>
    %13 = tpu.matmul %11, %0, %cst_5 {dimension_numbers = #tpu.dot_dimension_numbers<[1], [0], [0], [1], [0, 0, 1, 1], [], []>} : vector<8x64xf32>, vector<64x128xf32>, vector<8x128xf32> -> vector<8x128xf32>
    %14 = arith.mulf %12, %13 : vector<8x128xf32>
    %c0_6 = arith.constant 0 : index
    %c0_7 = arith.constant 0 : index
    %15 = vector.load %arg4[%c0_6, %c0_7] : memref<8x128xf32, #tpu.memory_space<vmem>>, vector<8x128xf32>
    tpu.vector_store %arg4[%c0_6, %c0_7], %14 {strides = array<i32>} : memref<8x128xf32, #tpu.memory_space<vmem>>, vector<8x128xf32>,
    return
  }
  func.func @transform_0(%arg0: i32) -> (i32, i32) {
    %c0_i32 = arith.constant 0 : i32
    %c0_i32_0 = arith.constant 0 : i32
    return %arg0, %c0_i32 : i32, i32
  }
  func.func @transform_1(%arg0: i32) -> (i32, i32) {
    %c0_i32 = arith.constant 0 : i32
    %c0_i32_0 = arith.constant 0 : i32
    return %arg0, %c0_i32 : i32, i32
  }
  func.func @transform_2(%arg0: i32) -> (i32, i32) {
    %c0_i32 = arith.constant 0 : i32
    %c0_i32_0 = arith.constant 0 : i32
    %c0_i32_1 = arith.constant 0 : i32
    return %c0_i32, %c0_i32_0 : i32, i32
  }
  func.func @transform_3(%arg0: i32) -> (i32, i32) {
    %c0_i32 = arith.constant 0 : i32
    %c0_i32_0 = arith.constant 0 : i32
    return %arg0, %c0_i32 : i32, i32
  }
}

</mosaic_0001>

<bundles_post_ra>
// kernel: tpu_custom_call.1
= control target key start
LH: loop header
LB: loop body
LE: loop exit
PB: predicated region body
PF: predicated region fallthrough
CT: control target
= control target key end

     0   :  { %8 = vsyncpa [#allocation3], 0  ;;  %s416_s0 = inlined_call_operand.vmem [shape: s32[8,1], index: 0, kind: input, shape index: {}]   ;;  %s417_s1 = inlined_call_operand.vmem [shape: s32[8,1], index: 1, kind: input, shape index: {}]   ;;  %s418_s2 = inlined_call_operand.hbm [shape: f32[64,128], index: 2, kind: input, shape index: {}]   ;;  %s419_s3 = inlined_call_operand.hbm [shape: f32[8,128], index: 3, kind: output, shape index: {}]  }
   0x1   :  { %9 = vsyncpa [#allocation4], 0  ;;  %s358_s12 = smov [#allocation2]   ;;  %s310_s16 = scalar_lea.hbm %s418_s2, 1024 }
   0x2   :  { %s19_s13 = sshll.u32 %s358_s12, 4  ;;  %p311_p0 = scmp.ne.s32.totalorder %s418_s2, %s310_s16  ;;  %s20_s13 = int_to_ptr.vmem [resolvable:$true] %s19_s13 }
   0x3   :  { %p314_p1 = scmp.lt.u32.totalorder %s310_s16, %s418_s2 }
   0x5   :  { %p316_p2 = pnand %p314_p1, %p311_p0 }
   0x7   :  { %319 = shalt.err (!%p316_p2)
}
   0x8   :  { %s320_s21 = scalar_lea.vmem %s20_s13, 1024  ;;  %p325_p4 = scmp.lt.s32.totalorder %s20_s13, %s20_s13 }
   0x9   :  { %p321_p3 = scmp.ne.s32.totalorder %s20_s13, %s320_s21  ;;  %p326_p5 = scmp.lt.s32.totalorder %s320_s21, %s320_s21 }
   0xb   :  { %p327_p6 = por %p326_p5, %p325_p4 }
   0xd   :  { %p328_p7 = pnand %p327_p6, %p321_p3 }
   0xf   :  { %331 = shalt.err (!%p328_p7)
}
  0x10   :  { %s359_s22 = smov 128   ;;  %s360_s23 = smov 8  }
  0x11   :  { %25 = dma.hbm_to_vmem [thread:$0]  %s418_s2, 1024, %s20_s13, [#allocation3], %s359_s22, %s359_s22, %s360_s23  }
  0x12   :  { %354 = dma.done.wait [#allocation3], 1024  }
  0x13   :  { %355 = vsyncadd [#allocation3], 4294966272  ;;  %v361_v0 = vmov 0   ;;  %v362_v1 = vmov 0.0|0.0   ;;  %v39_v2 = vld [vmem:[%s416_s0] sm:$0xff]  ;;  %v30_v4 = vld [vmem:[#allocation2 + $0x8] sm:$0xff]  ;;  %v37_v17 = vlaneseq }
  0x14   :  { %309 = vset.pattern.permute.xlu0 %v361_v0  ;;  %277 = vmatprep.subr.bf16.mxu0 %v362_v1  ;;  %v29_v3 = vld [vmem:[#allocation2] sm:$0xff]  ;;  %v31_v5 = vld [vmem:[#allocation2 + $0x10] sm:$0xff]  ;;  %v32_v6 = vld [vmem:[#allocation2 + $0x18] sm:$0xff]  ;;  %vm363_vm0 = vmmov 0   ;;  %v364_v9 = vmov 0.0   ;;  %vm53_vm1 = vcmask 523264  }
  0x15   :  { %289 = vmatprep.subr.bf16.mxu1 %v362_v1  ;;  %41 = vperm.xlu0 %309, %v39_v2   ;;  %v46_v7 = vld [vmem:[%s417_s1] sm:$0xff]  ;;  %v278_v8 = vpack.c.bf16 %v30_v4, %v29_v3  ;;  %v281_v10 = vpack.c.bf16 %v32_v6, %v31_v5  ;;  %v34_v12 = vld [vmem:[#allocation2 + $0x28] sm:$0xff]  ;;  %v35_v14 = vld [vmem:[#allocation2 + $0x30] sm:$0xff]  ;;  %v38_v18 = vand.u32 127, %v37_v17  ;;  %s365_s0 = smov [#allocation5]  }
  0x16   :  { %255 = vmatprep.mubr.msk.f32.mxu0 %vm363_vm0, %v364_v9  ;;  %274 = vmatprep.mubr.msk.f32.mxu1 %vm363_vm0, %v364_v9  ;;  %v33_v11 = vld [vmem:[#allocation2 + $0x20] sm:$0xff]  ;;  %v36_v15 = vld [vmem:[#allocation2 + $0x38] sm:$0xff]  ;;  %s208_s1 = sshll.u32 %s365_s0, 4  ;;  %s209_s1 = int_to_ptr.vmem [resolvable:$true] %s208_s1 }
  0x17   :  { %279 = vmatpush3.bf16.msra.mxu0 %v278_v8  ;;  %291 = vmatpush3.bf16.msra.mxu1 %v278_v8  ;;  %v284_v13 = vpack.c.bf16 %v34_v12, %v33_v11  ;;  %v287_v16 = vpack.c.bf16 %v36_v15, %v35_v14  ;;  %s332_s2 = scalar_lea.vmem %s209_s1, 128  ;;  %p337_p9 = scmp.lt.s32.totalorder %s209_s1, %s209_s1 }
  0x18   :  { %280 = vmatprep.subr.bf16.mxu0 %v362_v1  ;;  %292 = vmatprep.subr.bf16.mxu1 %v362_v1  ;;  %p333_p8 = scmp.ne.s32.totalorder %s209_s1, %s332_s2  ;;  %p338_p10 = scmp.lt.s32.totalorder %s332_s2, %s332_s2 }
  0x19   :  { %48 = vperm.xlu0 %309, %v46_v7  }
  0x1a   :  { %p339_p11 = por %p338_p10, %p337_p9 }
  0x1b   :  { %282 = vmatpush3.bf16.msra.mxu0 %v281_v10  ;;  %294 = vmatpush3.bf16.msra.mxu1 %v281_v10 }
  0x1c   :  { %283 = vmatprep.subr.bf16.mxu0 %v362_v1  ;;  %295 = vmatprep.subr.bf16.mxu1 %v362_v1  ;;  %p340_p12 = pnand %p339_p11, %p333_p8 }
  0x1f   :  { %285 = vmatpush3.bf16.msra.mxu0 %v284_v13  ;;  %297 = vmatpush3.bf16.msra.mxu1 %v284_v13 }
  0x20   :  { %286 = vmatprep.subr.bf16.mxu0 %v362_v1  ;;  %298 = vmatprep.subr.bf16.mxu1 %v362_v1 }
  0x23   :  { %288 = vmatpush3.bf16.msra.mxu0 %v287_v16  ;;  %300 = vmatpush3.bf16.msra.mxu1 %v287_v16 }
  0x94   :  { %v42_v19 = vpop.permute.xlu0 %41 }
  0x95   :  { %vm43_vm2 = vcmp.eq.s32.totalorder %v38_v18, %v42_v19 }
  0x96   :  { %v217_v20 = vsel %vm43_vm2, 1.0, %v364_v9 }
  0x97   :  { %256 = vmatmul.mubr.msk.f32.vlgmr.msra.gmra.mrb[0].mxu0 %vm53_vm1, %v217_v20 }
  0x98   :  { %v49_v21 = vpop.permute.xlu0 %48 }
  0x99   :  { %vm50_vm3 = vcmp.eq.s32.totalorder %v38_v18, %v49_v21 }
  0x9a   :  { %v218_v22 = vsel %vm50_vm3, 1.0, %v364_v9 }
  0x9b   :  { %275 = vmatmul.mubr.msk.f32.vlgmr.msra.gmra.mrb[0].mxu1 %vm53_vm1, %v218_v22 }
 0x16a   :  { %v123_v23 = vpop.f32.mrb[0].mxu0 }
 0x16b   :  { %v257_v24 = vpop.f32.mrb[1].mxu0 }
 0x16e   :  { %v196_v25 = vpop.f32.mrb[0].mxu1 }
 0x16f   :  { %v200_v26 = vmul.f32 %v196_v25, %v123_v23  ;;  %v276_v27 = vpop.f32.mrb[1].mxu1 }
 0x171   :  { %201 = vst [vmem:[#allocation5] sm:$0xff] %v200_v26 }
 0x172   :  { %343 = shalt.err (!%p340_p12)
}
 0x173   :  { %s344_s5 = scalar_lea.hbm %s419_s3, 128 }
 0x174   :  { %p345_p13 = scmp.ne.s32.totalorder %s419_s3, %s344_s5  ;;  %p348_p0 = scmp.lt.u32.totalorder %s344_s5, %s419_s3 }
 0x176   :  { %p350_p1 = pnand %p348_p0, %p345_p13 }
 0x178   :  { %353 = shalt.err (!%p350_p1)
}
 0x179   :  { %211 = dma.vmem_to_hbm [thread:$0]  %s209_s1, 128, %s419_s3, [#allocation4]  }
 0x17a   :  { %356 = dma.done.wait [#allocation4], 128  }
 0x17b   :  { %357 = vsyncadd [#allocation4], 4294967168 }
 0x17c   :  { %215 = vsyncpa [#allocation3], 1 }
 0x17d   :  { %216 = vsyncpa [#allocation4], 1 }

</bundles_post_ra>
